<compile_context>
chip_gen: v7x
topology: tpu7x:2x2x1
jax: 0.10.0
libtpu: 0.0.40
codegen_flags: <defaults>
</compile_context>

<pallas_src>
import functools

import jax
import jax.numpy as jnp
from jax import lax
from jax.experimental import pallas as pl
from jax.experimental.pallas import tpu as pltpu


def _round_up(x, m):
    return ((x + m - 1) // m) * m


def _vmem_budget_bytes():
    cap = 128 << 20
    try:
        info = pltpu.get_tpu_info()
        cap = int(getattr(info, "vmem_capacity_bytes", cap) or cap)
    except Exception:
        pass
    return (3 * cap) // 4      # ~96 MiB on v5e/v6e (128 MiB phys), ~48 MiB on v7x (64 MiB)


def _anyf_packed_kernel(p_ref, w_ref, b_ref, o_ref, *, n_seg, c_out):
    # p_ref: (tm, K_pad) compute dtype; w_ref: (K_pad, NC_pad) all segments packed
    # channel-contiguously (only the TOTAL padded to 128); b_ref: (1, NC_pad) f32;
    # o_ref: (tm, C_out_pad) f32 lane-dense output tile.
    y = jnp.dot(p_ref[...], w_ref[...], preferred_element_type=jnp.float32)
    y = jnp.maximum(y + b_ref[...], 0.0)                 # bias + relu, all segments at once
    acc = y[:, 0:c_out]
    for i in range(1, n_seg):                            # tiny lane-slice segment-sum
        acc = acc + y[:, i * c_out:(i + 1) * c_out]
    o_ref[...] = jnp.zeros_like(o_ref)                   # zero the padded lanes
    o_ref[:, 0:c_out] = acc.astype(o_ref.dtype)


def _anyf_seg_kernel(p_ref, w_ref, b_ref, o_ref, *, seg_per_step, c_out_pad):
    # Streams `seg_per_step` segments per grid step along the last ("arbitrary") grid
    # axis and accumulates into the resident f32 output tile -> no wide intermediate.
    @pl.when(pl.program_id(1) == 0)
    def _init():
        o_ref[...] = jnp.zeros_like(o_ref)

    y = jnp.dot(p_ref[...], w_ref[...], preferred_element_type=jnp.float32)
    y = jnp.maximum(y + b_ref[...], 0.0)                 # (tm, seg_per_step*c_out_pad)
    acc = y[:, 0:c_out_pad]
    for i in range(1, seg_per_step):                     # 128-aligned lane slices
        acc = acc + y[:, i * c_out_pad:(i + 1) * c_out_pad]
    o_ref[...] += acc


@functools.partial(jax.jit,
                   static_argnames=("stride", "padding", "n_seg", "nbits", "tm",
                                    "compute_dtype"))
def anyf_conv2d(x, weights, *, stride=1, padding=0, n_seg=4, nbits=8, tm=512,
                compute_dtype=jnp.bfloat16):
    """x: (N, C_in, H, W) f32; weights: (n_seg, C_out, C_in, kh, kw) f32 -> (N, C_out, Ho, Wo)."""
    N, C_in, H, W = x.shape
    n_seg_w, C_out, C_in_w, kh, kw = weights.shape
    assert n_seg_w == n_seg and C_in_w == C_in
    H_out = (H + 2 * padding - kh) // stride + 1
    W_out = (W + 2 * padding - kw) // stride + 1
    M = N * H_out * W_out
    K = C_in * kh * kw

    # QuantAct(nbits, 'symmetric') with clamp_only=True: per-tensor symmetric scale
    # s = max|x| / n; forward multiplies back by n -> s*n == max|x|.  Clamping x to its
    # own absmax is a no-op and is dropped (saves a full elementwise HBM pass).
    # TODO(synk): the real QuantAct may clamp to a learned/running threshold; outputs
    # diverge whenever that threshold != max|x| (per-tensor max used as approximation).
    nq = 2.0 ** (nbits - 1) - 1.0
    s_times_n = (jnp.max(jnp.abs(x)) / nq) * nq
    seg_bias = (jnp.linspace(-1.0, 1.0, 2 * n_seg + 1)[1::2] * s_times_n).astype(jnp.float32)

    # --- im2col built directly in (M, K) with K ordered (kh, kw, C_in): no transpose of
    # the kh*kw-expanded patches; only the (much smaller) input is relaid to NHWC. ---
    x_nhwc = jnp.transpose(x, (0, 2, 3, 1))
    xp = jnp.pad(x_nhwc, ((0, 0), (padding, padding), (padding, padding), (0, 0)))
    cols = []
    for i in range(kh):
        for j in range(kw):
            cols.append(xp[:, i:i + H_out * stride:stride, j:j + W_out * stride:stride, :])
    patches = jnp.concatenate(cols, axis=-1).reshape(M, K)

    itemsize = jnp.dtype(compute_dtype).itemsize
    sub = 16 if itemsize == 2 else 8
    # K is the lane axis of the patch tile: lane-dense (128-multiple) only if the extra
    # im2col HBM bytes stay under ~25%; otherwise just the sublane packing.
    k_lane = _round_up(K, 128)
    K_pad = k_lane if 4 * k_lane <= 5 * K else _round_up(K, sub)

    # tm: multiple of 16 (bf16 sublane packing), capped so M has >= 2 grid steps
    # (both v7x TensorCores get work under dimension_semantics=('parallel', ...)).
    tm_eff = max(16, min(tm, _round_up(pl.cdiv(M, 2), 16), _round_up(M, 16)))
    M_pad = _round_up(M, tm_eff)

    patches = jnp.pad(patches, ((0, M_pad - M), (0, K_pad - K))).astype(compute_dtype)

    # Weights: (n_seg, C_out, C_in, kh, kw) -> (n_seg, K, C_out), K ordered (kh, kw, C_in)
    # to match the patch layout.
    w_seg = jnp.transpose(weights, (0, 3, 4, 2, 1)).reshape(n_seg, K, C_out)

    C_out_pad = _round_up(C_out, 128)          # lane-dense output tile
    budget = _vmem_budget_bytes()

    if n_seg * C_out <= 128:
        # ---- packed mode (small C_out): all segments share one <=128-wide RHS ----
        NC = n_seg * C_out
        NC_pad = _round_up(NC, 128)
        w_big = jnp.transpose(w_seg, (1, 0, 2)).reshape(K, NC)          # seg-major, ch-minor
        w_big = jnp.pad(w_big, ((0, K_pad - K), (0, NC_pad - NC))).astype(compute_dtype)
        bias_row = jnp.pad(jnp.repeat(seg_bias, C_out), (0, NC_pad - NC)).reshape(1, NC_pad)

        working = (2 * tm_eff * K_pad * itemsize      # patch tile, double-buffered
                   + 2 * K_pad * NC_pad * itemsize    # packed weights
                   + 2 * NC_pad * 4                   # bias row
                   + 2 * tm_eff * C_out_pad * 4       # output tile
                   + 2 * tm_eff * NC_pad * 4)         # live f32 y + acc
        vmem_limit = int(min(budget, max(32 << 20, 2 * working)))

        out = pl.pallas_call(
            functools.partial(_anyf_packed_kernel, n_seg=n_seg, c_out=C_out),
            out_shape=jax.ShapeDtypeStruct((M_pad, C_out_pad), jnp.float32),
            grid_spec=pltpu.PrefetchScalarGridSpec(
                num_scalar_prefetch=0,
                grid=(M_pad // tm_eff,),
                in_specs=[
                    pl.BlockSpec((tm_eff, K_pad), lambda m: (m, 0)),    # patch tile
                    pl.BlockSpec((K_pad, NC_pad), lambda m: (0, 0)),    # packed weights
                    pl.BlockSpec((1, NC_pad), lambda m: (0, 0)),        # bias row
                ],
                out_specs=pl.BlockSpec((tm_eff, C_out_pad), lambda m: (m, 0)),
            ),
            compiler_params=pltpu.CompilerParams(
                dimension_semantics=("parallel",),
                vmem_limit_bytes=vmem_limit,
            ),
        )(patches, w_big, bias_row)
    else:
        # ---- per-segment streaming mode: grid axis over segment groups ----
        # Fuse 2 segments per step when each segment is exactly one 128-block so the
        # 256-wide MXU N stays full on v6e/v7x (128 already fills v5e).
        g = 2 if (C_out_pad == 128 and n_seg % 2 == 0) else 1
        n_groups = n_seg // g
        GCP = g * C_out_pad
        w_pad = jnp.pad(w_seg, ((0, 0), (0, K_pad - K), (0, C_out_pad - C_out)))
        w_grp = (w_pad.reshape(n_groups, g, K_pad, C_out_pad)
                 .transpose(0, 2, 1, 3)
                 .reshape(n_groups, K_pad, GCP)
                 .astype(compute_dtype))
        b_pad = jnp.pad(jnp.broadcast_to(seg_bias[:, None], (n_seg, C_out)),
                        ((0, 0), (0, C_out_pad - C_out)))
        b_grp = b_pad.reshape(n_groups, 1, GCP)

        working = (2 * tm_eff * K_pad * itemsize      # patch tile
                   + 2 * K_pad * GCP * itemsize       # streamed per-group weights
                   + 2 * GCP * 4                      # bias rows
                   + 2 * tm_eff * C_out_pad * 4       # output tile (resident accumulator)
                   + 2 * tm_eff * GCP * 4)            # live f32 y + acc
        vmem_limit = int(min(budget, max(32 << 20, 2 * working)))

        out = pl.pallas_call(
            functools.partial(_anyf_seg_kernel, seg_per_step=g, c_out_pad=C_out_pad),
            out_shape=jax.ShapeDtypeStruct((M_pad, C_out_pad), jnp.float32),
            grid_spec=pltpu.PrefetchScalarGridSpec(
                num_scalar_prefetch=0,
                grid=(M_pad // tm_eff, n_groups),
                in_specs=[
                    pl.BlockSpec((tm_eff, K_pad), lambda m, s: (m, 0)),       # patch tile
                    pl.BlockSpec((None, K_pad, GCP), lambda m, s: (s, 0, 0)),  # group weights
                    pl.BlockSpec((None, 1, GCP), lambda m, s: (s, 0, 0)),      # group bias
                ],
                out_specs=pl.BlockSpec((tm_eff, C_out_pad), lambda m, s: (m, 0)),
            ),
            compiler_params=pltpu.CompilerParams(
                dimension_semantics=("parallel", "arbitrary"),
                vmem_limit_bytes=vmem_limit,
            ),
        )(patches, w_grp, b_grp)

    # Drop padding, back to NCHW (the module returns NCHW).
    # TODO(synk): keep NHWC / emit bf16 here if the consumer accepts it (saves an HBM
    # pass that matters most on v5e); NCHW f32 kept to match the module's return.
    out = out[:M, :C_out].reshape(N, H_out, W_out, C_out).transpose(0, 3, 1, 2)
    return out


def _reference(x, weights, stride, padding, n_seg, nbits):
    nq = 2.0 ** (nbits - 1) - 1.0
    absmax = jnp.max(jnp.abs(x))
    s = (absmax / nq) * nq
    bias_vals = jnp.linspace(-1.0, 1.0, n_seg * 2 + 1)[1::2]
    outs = []
    for i in range(n_seg):
        y = lax.conv_general_dilated(
            x, weights[i], (stride, stride),
            [(padding, padding), (padding, padding)],
            dimension_numbers=("NCHW", "OIHW", "NCHW"))
        outs.append(y)
    y = jnp.stack(outs, axis=1)
    y = y + bias_vals.reshape(1, n_seg, 1, 1, 1) * s
    y = jnp.maximum(y, 0.0)
    return y.sum(axis=1)


if __name__ == "__main__":
    key = jax.random.PRNGKey(0)
    k_x, k_w, k_x2, k_w2 = jax.random.split(key, 4)
    n_seg, nbits = 4, 8

    # Case 1: small C_out (n_seg*C_out <= 128) -> packed single-dot mode.
    N, C_in, H, W = 2, 4, 16, 16
    C_out, ksz, stride, padding = 8, 3, 1, 1
    x = jax.random.normal(k_x, (N, C_in, H, W), dtype=jnp.float32)
    weights = 0.1 * jax.random.normal(k_w, (n_seg, C_out, C_in, ksz, ksz), dtype=jnp.float32)
    ref = _reference(x, weights, stride, padding, n_seg, nbits)

    out_f32 = jax.block_until_ready(anyf_conv2d(
        x, weights, stride=stride, padding=padding, n_seg=n_seg, nbits=nbits,
        compute_dtype=jnp.float32))
    assert out_f32.shape == (N, C_out, H, W), out_f32.shape
    assert jnp.allclose(out_f32, ref, atol=1e-3, rtol=1e-3), float(jnp.max(jnp.abs(out_f32 - ref)))

    out_bf16 = jax.block_until_ready(anyf_conv2d(
        x, weights, stride=stride, padding=padding, n_seg=n_seg, nbits=nbits,
        compute_dtype=jnp.bfloat16))
    assert out_bf16.shape == (N, C_out, H, W), out_bf16.shape
    assert jnp.allclose(out_bf16, ref, atol=1e-1, rtol=5e-2), float(jnp.max(jnp.abs(out_bf16 - ref)))

    # Case 2: C_out = 128 -> per-segment streaming mode (grid axis over segment pairs,
    # f32 accumulation into the resident output tile).
    N2, C_in2, H2, W2 = 2, 4, 8, 8
    C_out2, ksz2, stride2, padding2 = 128, 3, 1, 1
    x2 = jax.random.normal(k_x2, (N2, C_in2, H2, W2), dtype=jnp.float32)
    weights2 = 0.1 * jax.random.normal(k_w2, (n_seg, C_out2, C_in2, ksz2, ksz2),
                                       dtype=jnp.float32)
    ref2 = _reference(x2, weights2, stride2, padding2, n_seg, nbits)
    out2 = jax.block_until_ready(anyf_conv2d(
        x2, weights2, stride=stride2, padding=padding2, n_seg=n_seg, nbits=nbits,
        compute_dtype=jnp.float32))
    assert out2.shape == ref2.shape, out2.shape
    assert jnp.allclose(out2, ref2, atol=1e-3, rtol=1e-3), float(jnp.max(jnp.abs(out2 - ref2)))

    print("KERNEL_OK")
</pallas_src>

<mosaic_0001>
module attributes {stable_mosaic.version = 11 : i64} {
  func.func @_anyf_packed_kernel(%arg0: i32, %arg1: memref<256x40xf32, #tpu.memory_space<vmem>>, %arg2: memref<40x128xf32, #tpu.memory_space<vmem>>, %arg3: memref<1x128xf32, #tpu.memory_space<vmem>>, %arg4: memref<256x128xf32, #tpu.memory_space<vmem>>) attributes {dimension_semantics = [#tpu.dimension_semantics<parallel>], iteration_bounds = array<i64: 2>, scalar_prefetch = 0 : i64, scratch_operands = 0 : i64, tpu.core_type = #tpu.core_type<tc>, window_params = [{transform_indices = @transform_0, window_bounds = array<i64: 256, 40>}, {pipeline_mode = #tpu.pipeline_mode<synchronous>, transform_indices = @transform_1, window_bounds = array<i64: 40, 128>}, {pipeline_mode = #tpu.pipeline_mode<synchronous>, transform_indices = @transform_2, window_bounds = array<i64: 1, 128>}, {transform_indices = @transform_3, window_bounds = array<i64: 256, 128>}]} {
    %c0 = arith.constant 0 : index
    %c0_0 = arith.constant 0 : index
    %0 = vector.load %arg1[%c0, %c0_0] : memref<256x40xf32, #tpu.memory_space<vmem>>, vector<256x40xf32>
    %c0_1 = arith.constant 0 : index
    %c0_2 = arith.constant 0 : index
    %1 = vector.load %arg2[%c0_1, %c0_2] : memref<40x128xf32, #tpu.memory_space<vmem>>, vector<40x128xf32>
    %cst = arith.constant dense<0.000000e+00> : vector<256x128xf32>
    %2 = tpu.matmul %0, %1, %cst {dimension_numbers = #tpu.dot_dimension_numbers<[1], [0], [0], [1], [0, 0, 1, 1], [], []>} : vector<256x40xf32>, vector<40x128xf32>, vector<256x128xf32> -> vector<256x128xf32>
    %c0_3 = arith.constant 0 : index
    %c0_4 = arith.constant 0 : index
    %3 = vector.load %arg3[%c0_3, %c0_4] : memref<1x128xf32, #tpu.memory_space<vmem>>, vector<1x128xf32>
    %4 = vector.broadcast %3 : vector<1x128xf32> to vector<256x128xf32>
    %5 = arith.addf %2, %4 : vector<256x128xf32>
    %cst_5 = arith.constant 0.000000e+00 : f32
    %6 = vector.broadcast %cst_5 : f32 to vector<256x128xf32>
    %7 = arith.maximumf %5, %6 : vector<256x128xf32>
    %8 = vector.extract_strided_slice %7 {offsets = [0, 0], sizes = [256, 8], strides = [1, 1]} : vector<256x128xf32> to vector<256x8xf32>
    %9 = vector.extract_strided_slice %7 {offsets = [0, 8], sizes = [256, 8], strides = [1, 1]} : vector<256x128xf32> to vector<256x8xf32>
    %10 = arith.addf %8, %9 : vector<256x8xf32>
    %11 = vector.extract_strided_slice %7 {offsets = [0, 16], sizes = [256, 8], strides = [1, 1]} : vector<256x128xf32> to vector<256x8xf32>
    %12 = arith.addf %10, %11 : vector<256x8xf32>
    %13 = vector.extract_strided_slice %7 {offsets = [0, 24], sizes = [256, 8], strides = [1, 1]} : vector<256x128xf32> to vector<256x8xf32>
    %14 = arith.addf %12, %13 : vector<256x8xf32>
    %cst_6 = arith.constant 0.000000e+00 : f32
    %15 = vector.broadcast %cst_6 : f32 to vector<256x128xf32>
    %c0_7 = arith.constant 0 : index
    %c0_8 = arith.constant 0 : index
    %16 = vector.load %arg4[%c0_7, %c0_8] : memref<256x128xf32, #tpu.memory_space<vmem>>, vector<256x128xf32>
    tpu.vector_store %arg4[%c0_7, %c0_8], %15 {strides = array<i32>} : memref<256x128xf32, #tpu.memory_space<vmem>>, vector<256x128xf32>,
    %c0_9 = arith.constant 0 : index
    %c0_10 = arith.constant 0 : index
    %17 = vector.load %arg4[%c0_9, %c0_10] : memref<256x128xf32, #tpu.memory_space<vmem>>, vector<256x8xf32>
    tpu.vector_store %arg4[%c0_9, %c0_10], %14 {strides = array<i32>} : memref<256x128xf32, #tpu.memory_space<vmem>>, vector<256x8xf32>,
    return
  }
  func.func @transform_0(%arg0: i32) -> (i32, i32) {
    %c0_i32 = arith.constant 0 : i32
    %c0_i32_0 = arith.constant 0 : i32
    return %arg0, %c0_i32 : i32, i32
  }
  func.func @transform_1(%arg0: i32) -> (i32, i32) {
    %c0_i32 = arith.constant 0 : i32
    %c0_i32_0 = arith.constant 0 : i32
    %c0_i32_1 = arith.constant 0 : i32
    return %c0_i32, %c0_i32_0 : i32, i32
  }
  func.func @transform_2(%arg0: i32) -> (i32, i32) {
    %c0_i32 = arith.constant 0 : i32
    %c0_i32_0 = arith.constant 0 : i32
    %c0_i32_1 = arith.constant 0 : i32
    return %c0_i32, %c0_i32_0 : i32, i32
  }
  func.func @transform_3(%arg0: i32) -> (i32, i32) {
    %c0_i32 = arith.constant 0 : i32
    %c0_i32_0 = arith.constant 0 : i32
    return %arg0, %c0_i32 : i32, i32
  }
}

</mosaic_0001>

<bundles_post_ra>
// kernel: anyf_conv2d.1
= control target key start
LH: loop header
LB: loop body
LE: loop exit
PB: predicated region body
PF: predicated region fallthrough
CT: control target
= control target key end

     0   :  { %s1306_s12 = smov 0   ;;  %s1906_s0 = inlined_call_operand.vmem [shape: f32[512,40], index: 0, kind: input, shape index: {}]   ;;  %s1907_s1 = inlined_call_operand.vmem [shape: f32[40,128], index: 1, kind: input, shape index: {}]   ;;  %s1908_s2 = inlined_call_operand.vmem [shape: f32[1,128], index: 2, kind: input, shape index: {}]   ;;  %s1909_s3 = inlined_call_operand.vmem [shape: f32[512,128], index: 3, kind: output, shape index: {}]  }
   0x1 LB: > { %s1109_s13 = sadd.s32 4294967295, %s1280_s12   ;;  %p1113_p0 = scmp.ge.s32.totalorder %s1280_s12, 1  ;;  %s1280_s12 = sphi %s1306_s12, %s13_s12  }
   0x2   : > { %p138_p1 = scmp.lt.s32.totalorder %s1280_s12, 3 }
   0x4   : > { %p139_p2 = pnand %p1113_p0, %p138_p1 }
   0x5   : > { %v206_v0 = vld [vmem:[%s1907_s1] sm:$0xff] (!%p139_p2)  ;;  %v207_v1 = vld [vmem:[%s1907_s1 + $0x8] sm:$0xff] (!%p139_p2)  ;;  %v208_v2 = vld [vmem:[%s1907_s1 + $0x10] sm:$0xff] (!%p139_p2)  ;;  %s1114_s20 = sshll.u32 (!%p139_p2), %s1109_s13, 5  ;;  %vm218_vm0 = vcmask (!%p139_p2), 326656   ;;  %v1282_v46 = vmov (!%p139_p2), 0.0  }
   0x6   : > { %142 = sbr.rel (%p139_p2) target bundleno = 541 (0x21d), region = 32  ;;  %v1248_v3 = vpack.c.bf16 (!%p139_p2), %v207_v1, %v206_v0  ;;  %v209_v4 = vld [vmem:[%s1907_s1 + $0x18] sm:$0xff] (!%p139_p2)  ;;  %p163_p3 = scmp.lt.s32.totalorder (!%p139_p2), %s1114_s20, 63  ;;  %v210_v6 = vld [vmem:[%s1907_s1 + $0x20] sm:$0xff] (!%p139_p2)  ;;  %vm1020_vm1 = vcmask (!%p139_p2), 64512  }
   0x7   : > { %v1252_v5 = vpack.c.bf16 (!%p139_p2), %v209_v4, %v208_v2  ;;  %v1406_v39 = vld [vmem:[%s1908_s2] ss:$0 sm:$0xff] (!%p139_p2)  ;;  %s1283_s7 = smov (!%p139_p2), 120   ;;  %s1284_s8 = smov (!%p139_p2), 112  }
   0x8   : > { %1249 = vmatprep.subr.bf16.mxu0 (!%p139_p2), %v1248_v3  ;;  %1256 = vmatprep.subr.bf16.mxu1 (!%p139_p2), %v1248_v3  ;;  %s1285_s9 = smov (!%p139_p2), 104  }
   0x9   : > { %1251 = vmatpush3.bf16.msra.mxu0 (!%p139_p2), %v1248_v3  ;;  %1259 = vmatpush3.bf16.msra.mxu1 (!%p139_p2), %v1248_v3 }
   0xa   : > { %1253 = vmatprep.subr.bf16.mxu0 (!%p139_p2), %v1252_v5  ;;  %1257 = vmatprep.subr.bf16.mxu1 (!%p139_p2), %v1252_v5 }
   0xd   : > { %s1911_s20 = smov (!%p163_p3, %s1114_s20), 63  ;;  %1255 = vmatpush3.bf16.msra.mxu0 %v1252_v5  ;;  %1260 = vmatpush3.bf16.msra.mxu1 %v1252_v5 }
   0xe   : > { %s1115_s23 = sshll.u32 %s1911_s20, 3  ;;  %1198 = vmatprep.subr.mxu0 %v210_v6  ;;  %1258 = vmatprep.subr.mxu1 %v210_v6 }
   0xf   : > { %s1337_s28 = scalar_lea.vmem %s1906_s0, %s1115_s23  ;;  %s1413_s6 = scalar_lea.vmem %s1909_s3, %s1115_s23 }
  0x10   : > { %v174_v7 = vld [vmem:[%s1337_s28] sm:$0xff]  ;;  %v175_v9 = vld [vmem:[%s1337_s28 + $0x8] sm:$0xff]  ;;  %v176_v11 = vld [vmem:[%s1337_s28 + $0x10] sm:$0xff]  ;;  %989 = vst [vmem:[%s1413_s6 + $0x8] sm:$0xff] %v1282_v46 }
  0x11   : > { %v190_v8 = vld [vmem:[%s1337_s28 + $0x80] sm:$0xff]  ;;  %1200 = vmatprep.mubr.msk.f32.mxu0 %vm218_vm0, %v174_v7  ;;  %v191_v10 = vld [vmem:[%s1337_s28 + $0x88] sm:$0xff]  ;;  %v192_v12 = vld [vmem:[%s1337_s28 + $0x90] sm:$0xff]  ;;  %1199 = vmatpush3.msra.mxu0 %v210_v6  ;;  %988 = vst [vmem:[%s1413_s6] sm:$0xff] %v1282_v46 }
  0x12   : > { %1224 = vmatprep.mubr.msk.f32.mxu1 %vm218_vm0, %v190_v8  ;;  %1261 = vmatpush3.msra.mxu1 %v210_v6  ;;  %v177_v13 = vld [vmem:[%s1337_s28 + $0x18] sm:$0xff]  ;;  %v178_v15 = vld [vmem:[%s1337_s28 + $0x20] sm:$0xff]  ;;  %v179_v17 = vld [vmem:[%s1337_s28 + $0x28] sm:$0xff]  ;;  %990 = vst [vmem:[%s1413_s6 + $0x10] sm:$0xff] %v1282_v46 }
  0x13   : > { %1201 = vmatmul.mubr.msk.f32.vlgmr.msra.gmra.mrb[0].mxu0 %vm218_vm0, %v175_v9  ;;  %1225 = vmatmul.mubr.msk.f32.vlgmr.msra.gmra.mrb[0].mxu1 %vm218_vm0, %v191_v10  ;;  %v193_v14 = vld [vmem:[%s1337_s28 + $0x98] sm:$0xff]  ;;  %v194_v16 = vld [vmem:[%s1337_s28 + $0xa0] sm:$0xff]  ;;  %v195_v18 = vld [vmem:[%s1337_s28 + $0xa8] sm:$0xff]  ;;  %991 = vst [vmem:[%s1413_s6 + $0x18] sm:$0xff] %v1282_v46 }
  0x14   : > { %1203 = vmatprep.mubr.msk.f32.mxu0 %vm218_vm0, %v176_v11  ;;  %1227 = vmatprep.mubr.msk.f32.mxu1 %vm218_vm0, %v192_v12  ;;  %v180_v19 = vld [vmem:[%s1337_s28 + $0x30] sm:$0xff]  ;;  %v181_v21 = vld [vmem:[%s1337_s28 + $0x38] sm:$0xff]  ;;  %v182_v23 = vld [vmem:[%s1337_s28 + $0x40] sm:$0xff]  ;;  %992 = vst [vmem:[%s1413_s6 + $0x20] sm:$0xff] %v1282_v46 }
  0x15   : > { %v196_v20 = vld [vmem:[%s1337_s28 + $0xb0] sm:$0xff]  ;;  %v197_v22 = vld [vmem:[%s1337_s28 + $0xb8] sm:$0xff]  ;;  %v198_v24 = vld [vmem:[%s1337_s28 + $0xc0] sm:$0xff]  ;;  %993 = vst [vmem:[%s1413_s6 + $0x28] sm:$0xff] %v1282_v46 }
  0x16   : > { %v183_v25 = vld [vmem:[%s1337_s28 + $0x48] sm:$0xff]  ;;  %v184_v27 = vld [vmem:[%s1337_s28 + $0x50] sm:$0xff]  ;;  %v185_v29 = vld [vmem:[%s1337_s28 + $0x58] sm:$0xff]  ;;  %994 = vst [vmem:[%s1413_s6 + $0x30] sm:$0xff] %v1282_v46 }
  0x17   : > { %1204 = vmatmul.mubr.msk.f32.gmra.mrb[2].mxu0 %vm218_vm0, %v177_v13  ;;  %1228 = vmatmul.mubr.msk.f32.gmra.mrb[2].mxu1 %vm218_vm0, %v193_v14  ;;  %v199_v26 = vld [vmem:[%s1337_s28 + $0xc8] sm:$0xff]  ;;  %v200_v28 = vld [vmem:[%s1337_s28 + $0xd0] sm:$0xff]  ;;  %v201_v30 = vld [vmem:[%s1337_s28 + $0xd8] sm:$0xff]  ;;  %995 = vst [vmem:[%s1413_s6 + $0x38] sm:$0xff] %v1282_v46 }
  0x18   : > { %1206 = vmatprep.mubr.msk.f32.mxu0 %vm218_vm0, %v178_v15  ;;  %1230 = vmatprep.mubr.msk.f32.mxu1 %vm218_vm0, %v194_v16  ;;  %v186_v31 = vld [vmem:[%s1337_s28 + $0x60] sm:$0xff]  ;;  %v187_v33 = vld [vmem:[%s1337_s28 + $0x68] sm:$0xff]  ;;  %v188_v35 = vld [vmem:[%s1337_s28 + $0x70] sm:$0xff]  ;;  %996 = vst [vmem:[%s1413_s6 + $0x40] sm:$0xff] %v1282_v46 }
  0x19   : > { %v202_v32 = vld [vmem:[%s1337_s28 + $0xe0] sm:$0xff]  ;;  %v203_v34 = vld [vmem:[%s1337_s28 + $0xe8] sm:$0xff]  ;;  %v204_v36 = vld [vmem:[%s1337_s28 + $0xf0] sm:$0xff]  ;;  %997 = vst [vmem:[%s1413_s6 + $0x48] sm:$0xff] %v1282_v46 }
  0x1a   : > { %v189_v37 = vld [vmem:[%s1337_s28 + $0x78] sm:$0xff]  ;;  %998 = vst [vmem:[%s1413_s6 + $0x50] sm:$0xff] %v1282_v46  ;;  %999 = vst [vmem:[%s1413_s6 + $0x58] sm:$0xff] %v1282_v46 }
  0x1b   : > { %1207 = vmatmul.mubr.msk.f32.gmra.mrb[4].mxu0 %vm218_vm0, %v179_v17  ;;  %1231 = vmatmul.mubr.msk.f32.gmra.mrb[4].mxu1 %vm218_vm0, %v195_v18  ;;  %v205_v38 = vld [vmem:[%s1337_s28 + $0xf8] sm:$0xff]  ;;  %1000 = vst [vmem:[%s1413_s6 + $0x60] sm:$0xff] %v1282_v46  ;;  %1001 = vst [vmem:[%s1413_s6 + $0x68] sm:$0xff] %v1282_v46 }
  0x1c   : > { %1209 = vmatprep.mubr.msk.f32.mxu0 %vm218_vm0, %v180_v19  ;;  %1233 = vmatprep.mubr.msk.f32.mxu1 %vm218_vm0, %v196_v20  ;;  %1002 = vst [vmem:[%s1413_s6 + $0x70] sm:$0xff] %v1282_v46  ;;  %1003 = vst [vmem:[%s1413_s6 + $0x78] sm:$0xff] %v1282_v46 }
  0x1d   : > { %1004 = vst [vmem:[%s1413_s6 + $0x80] sm:$0xff] %v1282_v46  ;;  %1005 = vst [vmem:[%s1413_s6 + $0x88] sm:$0xff] %v1282_v46 }
  0x1e   : > { %1006 = vst [vmem:[%s1413_s6 + $0x90] sm:$0xff] %v1282_v46  ;;  %1007 = vst [vmem:[%s1413_s6 + $0x98] sm:$0xff] %v1282_v46 }
  0x1f   : > { %1210 = vmatmul.mubr.msk.f32.gmra.mrb[6].mxu0 %vm218_vm0, %v181_v21  ;;  %1234 = vmatmul.mubr.msk.f32.gmra.mrb[6].mxu1 %vm218_vm0, %v197_v22  ;;  %1008 = vst [vmem:[%s1413_s6 + $0xa0] sm:$0xff] %v1282_v46  ;;  %1009 = vst [vmem:[%s1413_s6 + $0xa8] sm:$0xff] %v1282_v46 }
  0x20   : > { %1212 = vmatprep.mubr.msk.f32.mxu0 %vm218_vm0, %v182_v23  ;;  %1236 = vmatprep.mubr.msk.f32.mxu1 %vm218_vm0, %v198_v24  ;;  %1010 = vst [vmem:[%s1413_s6 + $0xb0] sm:$0xff] %v1282_v46  ;;  %1011 = vst [vmem:[%s1413_s6 + $0xb8] sm:$0xff] %v1282_v46 }
  0x21   : > { %1012 = vst [vmem:[%s1413_s6 + $0xc0] sm:$0xff] %v1282_v46  ;;  %1013 = vst [vmem:[%s1413_s6 + $0xc8] sm:$0xff] %v1282_v46 }
  0x22   : > { %1014 = vst [vmem:[%s1413_s6 + $0xd0] sm:$0xff] %v1282_v46  ;;  %1015 = vst [vmem:[%s1413_s6 + $0xd8] sm:$0xff] %v1282_v46 }
  0x23   : > { %1213 = vmatmul.mubr.msk.f32.gmra.mrb[8].mxu0 %vm218_vm0, %v183_v25  ;;  %1237 = vmatmul.mubr.msk.f32.gmra.mrb[8].mxu1 %vm218_vm0, %v199_v26  ;;  %1016 = vst [vmem:[%s1413_s6 + $0xe0] sm:$0xff] %v1282_v46  ;;  %1017 = vst [vmem:[%s1413_s6 + $0xe8] sm:$0xff] %v1282_v46 }
  0x24   : > { %1215 = vmatprep.mubr.msk.f32.mxu0 %vm218_vm0, %v184_v27  ;;  %1239 = vmatprep.mubr.msk.f32.mxu1 %vm218_vm0, %v200_v28  ;;  %1018 = vst [vmem:[%s1413_s6 + $0xf0] sm:$0xff] %v1282_v46  ;;  %1019 = vst [vmem:[%s1413_s6 + $0xf8] sm:$0xff] %v1282_v46 }
  0x27   : > { %1216 = vmatmul.mubr.msk.f32.gmra.mrb[10].mxu0 %vm218_vm0, %v185_v29  ;;  %1240 = vmatmul.mubr.msk.f32.gmra.mrb[10].mxu1 %vm218_vm0, %v201_v30 }
  0x28   : > { %1218 = vmatprep.mubr.msk.f32.mxu0 %vm218_vm0, %v186_v31  ;;  %1242 = vmatprep.mubr.msk.f32.mxu1 %vm218_vm0, %v202_v32 }
  0x2b   : > { %1219 = vmatmul.mubr.msk.f32.gmra.mrb[12].mxu0 %vm218_vm0, %v187_v33  ;;  %1243 = vmatmul.mubr.msk.f32.gmra.mrb[12].mxu1 %vm218_vm0, %v203_v34 }
  0x2c   : > { %1221 = vmatprep.mubr.msk.f32.mxu0 %vm218_vm0, %v188_v35  ;;  %1245 = vmatprep.mubr.msk.f32.mxu1 %vm218_vm0, %v204_v36 }
  0x2f   : > { %1222 = vmatmul.mubr.msk.f32.gmra.mrb[14].mxu0 %vm218_vm0, %v189_v37  ;;  %1246 = vmatmul.mubr.msk.f32.gmra.mrb[14].mxu1 %vm218_vm0, %v205_v38 }
  0xe6   : > { %v1202_v40 = vpop.f32.mrb[0].mxu0  ;;  %v1226_v41 = vpop.f32.mrb[0].mxu1 }
  0xe7   : > { %v387_v42 = vadd.f32 %v1202_v40, %v1406_v39  ;;  %v467_v43 = vadd.f32 %v1226_v41, %v1406_v39  ;;  %v381_v44 = vpop.f32.mrb[1].mxu0  ;;  %v461_v45 = vpop.f32.mrb[1].mxu1 }
  0xe8   : > { %v382_v49 = vadd.f32 %v1406_v39, %v381_v44  ;;  %v462_v55 = vadd.f32 %v1406_v39, %v461_v45 }
  0xe9   : > { %v1449_v47 = vmax.f32 %v387_v42, 0.0  ;;  %v1451_v48 = vmax.f32 %v467_v43, 0.0 }
  0xea   : > { %v1205_v50 = vpop.f32.mrb[2].mxu0  ;;  %v1229_v51 = vpop.f32.mrb[2].mxu1  ;;  %v1458_v54 = vmax.f32 %v382_v49, 0.0  ;;  %v1473_v60 = vmax.f32 %v462_v55, 0.0 }
  0xeb   : > { %638 = vrot.lane.b32.xlu1 %v1451_v48, %s1283_s7  ;;  %606 = vrot.lane.b32.xlu0 %v1449_v47, %s1283_s7  ;;  %v391_v52 = vpop.f32.mrb[3].mxu0  ;;  %v471_v53 = vpop.f32.mrb[3].mxu1  ;;  %v397_v7 = vadd.f32 %v1205_v50, %v1406_v39  ;;  %v477_v17 = vadd.f32 %v1229_v51, %v1406_v39 }
  0xec   : > { %v472_v33 = vadd.f32 %v1406_v39, %v471_v53  ;;  %v392_v34 = vadd.f32 %v1406_v39, %v391_v52 }
  0xed   : > { %v1508_v16 = vmax.f32 %v397_v7, 0.0  ;;  %v1527_v26 = vmax.f32 %v477_v17, 0.0 }
  0xee   : > { %v1461_v56 = vpop.f32.mrb[4].mxu0  ;;  %v1463_v57 = vpop.f32.mrb[4].mxu1  ;;  %v1551_v35 = vmax.f32 %v472_v33, 0.0  ;;  %v1557_v36 = vmax.f32 %v392_v34, 0.0 }
  0xef   : > { %734 = vrot.lane.b32.xlu1 %v1449_v47, %s1284_s8  ;;  %604 = vrot.lane.b32.xlu0 %v1458_v54, %s1283_s7  ;;  %v1469_v58 = vpop.f32.mrb[5].mxu0  ;;  %v1471_v59 = vpop.f32.mrb[5].mxu1  ;;  %v407_v46 = vadd.f32 %v1461_v56, %v1406_v39  ;;  %v487_v52 = vadd.f32 %v1463_v57, %v1406_v39 }
  0xf0   : > { %v402_v49 = vadd.f32 %v1406_v39, %v1469_v58  ;;  %v482_v53 = vadd.f32 %v1406_v39, %v1471_v59 }
  0xf1   : > { %v1587_v50 = vmax.f32 %v407_v46, 0.0  ;;  %v1599_v55 = vmax.f32 %v487_v52, 0.0 }
  0xf2   : > { %v1211_v61 = vpop.f32.mrb[6].mxu0  ;;  %v1235_v62 = vpop.f32.mrb[6].mxu1  ;;  %v1589_v51 = vmax.f32 %v402_v49, 0.0  ;;  %v1601_v56 = vmax.f32 %v482_v53, 0.0 }
  0xf3   : > { %766 = vrot.lane.b32.xlu1 %v1451_v48, %s1284_s8  ;;  %636 = vrot.lane.b32.xlu0 %v1473_v60, %s1283_s7  ;;  %v1480_v63 = vadd.f32 %v1211_v61, %v1406_v39  ;;  %v411_v0 = vpop.f32.mrb[7].mxu0  ;;  %v1483_v1 = vadd.f32 %v1235_v62, %v1406_v39  ;;  %v491_v2 = vpop.f32.mrb[7].mxu1 }
  0xf4   : > { %v1486_v3 = vadd.f32 %v1406_v39, %v411_v0  ;;  %v1489_v4 = vadd.f32 %v1406_v39, %v491_v2 }
  0xf5   : > { %v1634_v58 = vmax.f32 %v1483_v1, 0.0 }
  0xf6   : > { %v1214_v5 = vpop.f32.mrb[8].mxu0  ;;  %v1238_v6 = vpop.f32.mrb[8].mxu1  ;;  %v1627_v57 = vmax.f32 %v1486_v3, 0.0  ;;  %v1637_v59 = vmax.f32 %v1489_v4, 0.0 }
  0xf7   : > { %862 = vrot.lane.b32.xlu1 %v1449_v47, %s1285_s9  ;;  %732 = vrot.lane.b32.xlu0 %v1458_v54, %s1284_s8  ;;  %v1497_v8 = vadd.f32 %v1214_v5, %v1406_v39  ;;  %v421_v9 = vpop.f32.mrb[9].mxu0  ;;  %v1500_v10 = vadd.f32 %v1238_v6, %v1406_v39  ;;  %v501_v11 = vpop.f32.mrb[9].mxu1 }
  0xf8   : > { %v1503_v12 = vadd.f32 %v1406_v39, %v421_v9  ;;  %v1506_v13 = vadd.f32 %v1406_v39, %v501_v11 }
  0xf9   : > { %v1660_v61 = vmax.f32 %v1497_v8, 0.0 }
  0xfa   : > { %v1217_v14 = vpop.f32.mrb[10].mxu0  ;;  %v1241_v15 = vpop.f32.mrb[10].mxu1  ;;  %v1663_v62 = vmax.f32 %v1503_v12, 0.0  ;;  %v1673_v0 = vmax.f32 %v1506_v13, 0.0 }
  0xfb   : > { %894 = vrot.lane.b32.xlu1 %v1451_v48, %s1285_s9  ;;  %764 = vrot.lane.b32.xlu0 %v1473_v60, %s1284_s8  ;;  %v1516_v18 = vadd.f32 %v1217_v14, %v1406_v39  ;;  %v431_v19 = vpop.f32.mrb[11].mxu0  ;;  %v1519_v20 = vadd.f32 %v1241_v15, %v1406_v39  ;;  %v511_v21 = vpop.f32.mrb[11].mxu1 }
  0xfc   : > { %v1522_v22 = vadd.f32 %v1406_v39, %v431_v19  ;;  %v1525_v23 = vadd.f32 %v1406_v39, %v511_v21 }
  0xfd   : > { %v1696_v3 = vmax.f32 %v1516_v18, 0.0  ;;  %v1706_v7 = vmax.f32 %v1519_v20, 0.0 }
  0xfe   : > { %v1220_v24 = vpop.f32.mrb[12].mxu0  ;;  %v1244_v25 = vpop.f32.mrb[12].mxu1  ;;  %v1699_v4 = vmax.f32 %v1522_v22, 0.0  ;;  %v1709_v8 = vmax.f32 %v1525_v23, 0.0 }
  0xff   : > { %610 = vrot.lane.b32.xlu1 %v1508_v16, %s1283_s7  ;;  %860 = vrot.lane.b32.xlu0 %v1458_v54, %s1285_s9  ;;  %v1534_v27 = vadd.f32 %v1220_v24, %v1406_v39  ;;  %v441_v28 = vpop.f32.mrb[13].mxu0  ;;  %v1537_v29 = vadd.f32 %v1244_v25, %v1406_v39  ;;  %v521_v30 = vpop.f32.mrb[13].mxu1 }
 0x100   : > { %v1540_v31 = vadd.f32 %v1406_v39, %v441_v28  ;;  %v1543_v32 = vadd.f32 %v1406_v39, %v521_v30 }
 0x101   : > { %v1742_v34 = vmax.f32 %v1534_v27, 0.0 }
 0x102   : > { %v1223_v37 = vpop.f32.mrb[14].mxu0  ;;  %v1247_v42 = vpop.f32.mrb[14].mxu1 }
 0x103   : > { %642 = vrot.lane.b32.xlu1 %v1527_v26, %s1283_s7  ;;  %892 = vrot.lane.b32.xlu0 %v1473_v60, %s1285_s9  ;;  %v451_v38 = vpop.f32.mrb[15].mxu0  ;;  %v1564_v40 = vadd.f32 %v1223_v37, %v1406_v39  ;;  %v1574_v43 = vadd.f32 %v1247_v42, %v1406_v39  ;;  %v531_v44 = vpop.f32.mrb[15].mxu1  ;;  %v1745_v37 = vmax.f32 %v1540_v31, 0.0  ;;  %v1754_v42 = vmax.f32 %v1537_v29, 0.0 }
 0x104   : > { %v1567_v41 = vadd.f32 %v1406_v39, %v451_v38  ;;  %v1577_v45 = vadd.f32 %v1406_v39, %v531_v44  ;;  %v1624_v39 = vmax.f32 %v1480_v63, 0.0  ;;  %v1670_v63 = vmax.f32 %v1500_v10, 0.0 }
 0x105   : > { %v1757_v44 = vmax.f32 %v1543_v32, 0.0 }
 0x107   : > { %738 = vrot.lane.b32.xlu1 %v1508_v16, %s1284_s8  ;;  %640 = vrot.lane.b32.xlu0 %v1551_v35, %s1283_s7 }
 0x10b   : > { %770 = vrot.lane.b32.xlu1 %v1527_v26, %s1284_s8  ;;  %736 = vrot.lane.b32.xlu0 %v1557_v36, %s1284_s8 }
 0x10f   : > { %866 = vrot.lane.b32.xlu1 %v1508_v16, %s1285_s9  ;;  %768 = vrot.lane.b32.xlu0 %v1551_v35, %s1284_s8 }
 0x113   : > { %898 = vrot.lane.b32.xlu1 %v1527_v26, %s1285_s9  ;;  %864 = vrot.lane.b32.xlu0 %v1557_v36, %s1285_s9 }
 0x117   : > { %608 = vrot.lane.b32.xlu1 %v1557_v36, %s1283_s7  ;;  %896 = vrot.lane.b32.xlu0 %v1551_v35, %s1285_s9 }
 0x11b   : > { %614 = vrot.lane.b32.xlu1 %v1587_v50, %s1283_s7  ;;  %612 = vrot.lane.b32.xlu0 %v1589_v51, %s1283_s7 }
 0x11f   : > { %646 = vrot.lane.b32.xlu1 %v1599_v55, %s1283_s7  ;;  %644 = vrot.lane.b32.xlu0 %v1601_v56, %s1283_s7 }
 0x123   : > { %742 = vrot.lane.b32.xlu1 %v1587_v50, %s1284_s8  ;;  %740 = vrot.lane.b32.xlu0 %v1589_v51, %s1284_s8 }
 0x127   : > { %774 = vrot.lane.b32.xlu1 %v1599_v55, %s1284_s8  ;;  %772 = vrot.lane.b32.xlu0 %v1601_v56, %s1284_s8 }
 0x12b   : > { %870 = vrot.lane.b32.xlu1 %v1587_v50, %s1285_s9  ;;  %868 = vrot.lane.b32.xlu0 %v1589_v51, %s1285_s9 }
 0x12f   : > { %902 = vrot.lane.b32.xlu1 %v1599_v55, %s1285_s9  ;;  %900 = vrot.lane.b32.xlu0 %v1601_v56, %s1285_s9 }
 0x133   : > { %618 = vrot.lane.b32.xlu1 %v1624_v39, %s1283_s7  ;;  %616 = vrot.lane.b32.xlu0 %v1627_v57, %s1283_s7 }
 0x137   : > { %650 = vrot.lane.b32.xlu1 %v1634_v58, %s1283_s7  ;;  %648 = vrot.lane.b32.xlu0 %v1637_v59, %s1283_s7 }
 0x13b   : > { %746 = vrot.lane.b32.xlu1 %v1624_v39, %s1284_s8  ;;  %744 = vrot.lane.b32.xlu0 %v1627_v57, %s1284_s8 }
 0x13f   : > { %778 = vrot.lane.b32.xlu1 %v1634_v58, %s1284_s8  ;;  %776 = vrot.lane.b32.xlu0 %v1637_v59, %s1284_s8 }
 0x143   : > { %874 = vrot.lane.b32.xlu1 %v1624_v39, %s1285_s9  ;;  %872 = vrot.lane.b32.xlu0 %v1627_v57, %s1285_s9 }
 0x147   : > { %906 = vrot.lane.b32.xlu1 %v1634_v58, %s1285_s9  ;;  %904 = vrot.lane.b32.xlu0 %v1637_v59, %s1285_s9 }
 0x14b   : > { %622 = vrot.lane.b32.xlu1 %v1660_v61, %s1283_s7  ;;  %620 = vrot.lane.b32.xlu0 %v1663_v62, %s1283_s7 }
 0x14f   : > { %654 = vrot.lane.b32.xlu1 %v1670_v63, %s1283_s7  ;;  %652 = vrot.lane.b32.xlu0 %v1673_v0, %s1283_s7 }
 0x153   : > { %750 = vrot.lane.b32.xlu1 %v1660_v61, %s1284_s8  ;;  %748 = vrot.lane.b32.xlu0 %v1663_v62, %s1284_s8 }
 0x157   : > { %782 = vrot.lane.b32.xlu1 %v1670_v63, %s1284_s8  ;;  %780 = vrot.lane.b32.xlu0 %v1673_v0, %s1284_s8 }
 0x15b   : > { %878 = vrot.lane.b32.xlu1 %v1660_v61, %s1285_s9  ;;  %876 = vrot.lane.b32.xlu0 %v1663_v62, %s1285_s9 }
 0x15d   : > { %v639_v1 = vpop.permute.xlu1 %638  ;;  %v607_v2 = vpop.permute.xlu0 %606 }
 0x15e   : > { %v701_v11 = vadd.f32 %v607_v2, %v1449_v47  ;;  %v717_v15 = vadd.f32 %v639_v1, %v1451_v48 }
 0x15f   : > { %910 = vrot.lane.b32.xlu1 %v1670_v63, %s1285_s9  ;;  %908 = vrot.lane.b32.xlu0 %v1673_v0, %s1285_s9 }
 0x161   : > { %v735_v5 = vpop.permute.xlu1 %734  ;;  %v605_v6 = vpop.permute.xlu0 %604 }
 0x162   : > { %v829_v12 = vadd.f32 %v735_v5, %v701_v11  ;;  %v700_v20 = vadd.f32 %v605_v6, %v1458_v54 }
 0x163   : > { %626 = vrot.lane.b32.xlu1 %v1696_v3, %s1283_s7  ;;  %624 = vrot.lane.b32.xlu0 %v1699_v4, %s1283_s7 }
 0x165   : > { %v767_v9 = vpop.permute.xlu1 %766  ;;  %v637_v10 = vpop.permute.xlu0 %636 }
 0x166   : > { %v845_v47 = vadd.f32 %v767_v9, %v717_v15  ;;  %v716_v24 = vadd.f32 %v637_v10, %v1473_v60 }
 0x167   : > { %658 = vrot.lane.b32.xlu1 %v1706_v7, %s1283_s7  ;;  %656 = vrot.lane.b32.xlu0 %v1709_v8, %s1283_s7 }
 0x169   : > { %v863_v13 = vpop.permute.xlu1 %862  ;;  %v733_v14 = vpop.permute.xlu0 %732 }
 0x16a   : > { %v957_v17 = vadd.f32 %v863_v13, %v829_v12  ;;  %v828_v48 = vadd.f32 %v733_v14, %v700_v20  ;;  %v1805_v20 = vmax.f32 %v1577_v45, 0.0 }
 0x16b   : > { %754 = vrot.lane.b32.xlu1 %v1696_v3, %s1284_s8  ;;  %752 = vrot.lane.b32.xlu0 %v1699_v4, %s1284_s8 }
 0x16c   : > { %1022 = vst.msk [vmem:[%s1413_s6 + $0x8] sm:$0xff] %vm1020_vm1, %v957_v17  ;;  %v1790_v17 = vmax.f32 %v1564_v40, 0.0 }
 0x16d   : > { %v895_v18 = vpop.permute.xlu1 %894  ;;  %v765_v19 = vpop.permute.xlu0 %764 }
 0x16e   : > { %v973_v21 = vadd.f32 %v895_v18, %v845_v47  ;;  %v844_v54 = vadd.f32 %v765_v19, %v716_v24  ;;  %v1793_v47 = vmax.f32 %v1567_v41, 0.0  ;;  %v1802_v19 = vmax.f32 %v1574_v43, 0.0 }
 0x16f   : > { %786 = vrot.lane.b32.xlu1 %v1706_v7, %s1284_s8  ;;  %784 = vrot.lane.b32.xlu0 %v1709_v8, %s1284_s8 }
 0x170   : > { %1038 = vst.msk [vmem:[%s1413_s6 + $0x88] sm:$0xff] %vm1020_vm1, %v973_v21 }
 0x171   : > { %v611_v22 = vpop.permute.xlu1 %610  ;;  %v861_v23 = vpop.permute.xlu0 %860 }
 0x172   : > { %v956_v25 = vadd.f32 %v861_v23, %v828_v48  ;;  %v703_v46 = vadd.f32 %v611_v22, %v1508_v16 }
 0x173   : > { %882 = vrot.lane.b32.xlu1 %v1696_v3, %s1285_s9  ;;  %880 = vrot.lane.b32.xlu0 %v1699_v4, %s1285_s9 }
 0x174   : > { %1021 = vst.msk [vmem:[%s1413_s6] sm:$0xff] %vm1020_vm1, %v956_v25 }
 0x175   : > { %v643_v28 = vpop.permute.xlu1 %642  ;;  %v893_v30 = vpop.permute.xlu0 %892 }
 0x176   : > { %v972_v33 = vadd.f32 %v893_v30, %v844_v54  ;;  %v719_v52 = vadd.f32 %v643_v28, %v1527_v26 }
 0x177   : > { %914 = vrot.lane.b32.xlu1 %v1706_v7, %s1285_s9  ;;  %912 = vrot.lane.b32.xlu0 %v1709_v8, %s1285_s9 }
 0x178   : > { %1037 = vst.msk [vmem:[%s1413_s6 + $0x80] sm:$0xff] %vm1020_vm1, %v972_v33 }
 0x179   : > { %v739_v60 = vpop.permute.xlu1 %738  ;;  %v641_v38 = vpop.permute.xlu0 %640 }
 0x17a   : > { %v831_v29 = vadd.f32 %v739_v60, %v703_v46  ;;  %v718_v5 = vadd.f32 %v641_v38, %v1551_v35 }
 0x17b   : > { %630 = vrot.lane.b32.xlu1 %v1742_v34, %s1283_s7  ;;  %628 = vrot.lane.b32.xlu0 %v1745_v37, %s1283_s7 }
 0x17d   : > { %v771_v27 = vpop.permute.xlu1 %770  ;;  %v737_v31 = vpop.permute.xlu0 %736 }
 0x17e   : > { %v847_v16 = vadd.f32 %v771_v27, %v719_v52 }
 0x17f   : > { %662 = vrot.lane.b32.xlu1 %v1754_v42, %s1283_s7  ;;  %660 = vrot.lane.b32.xlu0 %v1757_v44, %s1283_s7 }
 0x181   : > { %v867_v32 = vpop.permute.xlu1 %866  ;;  %v769_v49 = vpop.permute.xlu0 %768 }
 0x182   : > { %v959_v53 = vadd.f32 %v867_v32, %v831_v29  ;;  %v846_v26 = vadd.f32 %v769_v49, %v718_v5 }
 0x183   : > { %758 = vrot.lane.b32.xlu1 %v1742_v34, %s1284_s8  ;;  %756 = vrot.lane.b32.xlu0 %v1745_v37, %s1284_s8 }
 0x184   : > { %1024 = vst.msk [vmem:[%s1413_s6 + $0x18] sm:$0xff] %vm1020_vm1, %v959_v53 }
 0x185   : > { %v899_v1 = vpop.permute.xlu1 %898  ;;  %v865_v2 = vpop.permute.xlu0 %864 }
 0x186   : > { %v975_v6 = vadd.f32 %v899_v1, %v847_v16 }
 0x187   : > { %790 = vrot.lane.b32.xlu1 %v1754_v42, %s1284_s8  ;;  %788 = vrot.lane.b32.xlu0 %v1757_v44, %s1284_s8 }
 0x188   : > { %1040 = vst.msk [vmem:[%s1413_s6 + $0x98] sm:$0xff] %vm1020_vm1, %v975_v6 }
 0x189   : > { %v609_v9 = vpop.permute.xlu1 %608  ;;  %v897_v10 = vpop.permute.xlu0 %896 }
 0x18a   : > { %v702_v11 = vadd.f32 %v609_v9, %v1557_v36  ;;  %v974_v12 = vadd.f32 %v897_v10, %v846_v26 }
 0x18b   : > { %886 = vrot.lane.b32.xlu1 %v1742_v34, %s1285_s9  ;;  %884 = vrot.lane.b32.xlu0 %v1745_v37, %s1285_s9 }
 0x18c   : > { %v830_v35 = vadd.f32 %v737_v31, %v702_v11  ;;  %1039 = vst.msk [vmem:[%s1413_s6 + $0x90] sm:$0xff] %vm1020_vm1, %v974_v12 }
 0x18d   : > { %v615_v13 = vpop.permute.xlu1 %614  ;;  %v613_v14 = vpop.permute.xlu0 %612 }
 0x18e   : > { %v958_v15 = vadd.f32 %v865_v2, %v830_v35  ;;  %v705_v48 = vadd.f32 %v615_v13, %v1587_v50  ;;  %v704_v45 = vadd.f32 %v613_v14, %v1589_v51 }
 0x18f   : > { %918 = vrot.lane.b32.xlu1 %v1754_v42, %s1285_s9  ;;  %916 = vrot.lane.b32.xlu0 %v1757_v44, %s1285_s9 }
 0x190   : > { %1023 = vst.msk [vmem:[%s1413_s6 + $0x10] sm:$0xff] %vm1020_vm1, %v958_v15 }
 0x191   : > { %v647_v36 = vpop.permute.xlu1 %646  ;;  %v645_v18 = vpop.permute.xlu0 %644 }
 0x192   : > { %v721_v54 = vadd.f32 %v647_v36, %v1599_v55  ;;  %v720_v28 = vadd.f32 %v645_v18, %v1601_v56 }
 0x193   : > { %634 = vrot.lane.b32.xlu1 %v1790_v17, %s1283_s7  ;;  %632 = vrot.lane.b32.xlu0 %v1793_v47, %s1283_s7 }
 0x195   : > { %v743_v40 = vpop.permute.xlu1 %742  ;;  %v741_v41 = vpop.permute.xlu0 %740 }
 0x196   : > { %v833_v22 = vadd.f32 %v743_v40, %v705_v48  ;;  %v832_v23 = vadd.f32 %v741_v41, %v704_v45 }
 0x197   : > { %666 = vrot.lane.b32.xlu1 %v1802_v19, %s1283_s7  ;;  %664 = vrot.lane.b32.xlu0 %v1805_v20, %s1283_s7 }
 0x199   : > { %v775_v21 = vpop.permute.xlu1 %774  ;;  %v773_v43 = vpop.permute.xlu0 %772 }
 0x19a   : > { %v849_v51 = vadd.f32 %v775_v21, %v721_v54  ;;  %v848_v33 = vadd.f32 %v773_v43, %v720_v28 }
 0x19b   : > { %762 = vrot.lane.b32.xlu1 %v1790_v17, %s1284_s8  ;;  %760 = vrot.lane.b32.xlu0 %v1793_v47, %s1284_s8 }
 0x19d   : > { %v871_v24 = vpop.permute.xlu1 %870  ;;  %v869_v25 = vpop.permute.xlu0 %868 }
 0x19e   : > { %v961_v50 = vadd.f32 %v871_v24, %v833_v22  ;;  %v960_v30 = vadd.f32 %v869_v25, %v832_v23 }
 0x19f   : > { %794 = vrot.lane.b32.xlu1 %v1802_v19, %s1284_s8  ;;  %792 = vrot.lane.b32.xlu0 %v1805_v20, %s1284_s8 }
 0x1a0   : > { %1026 = vst.msk [vmem:[%s1413_s6 + $0x28] sm:$0xff] %vm1020_vm1, %v961_v50  ;;  %1025 = vst.msk [vmem:[%s1413_s6 + $0x20] sm:$0xff] %vm1020_vm1, %v960_v30 }
 0x1a1   : > { %v903_v60 = vpop.permute.xlu1 %902  ;;  %v901_v55 = vpop.permute.xlu0 %900 }
 0x1a2   : > { %v977_v38 = vadd.f32 %v903_v60, %v849_v51  ;;  %v976_v27 = vadd.f32 %v901_v55, %v848_v33 }
 0x1a3   : > { %890 = vrot.lane.b32.xlu1 %v1790_v17, %s1285_s9  ;;  %888 = vrot.lane.b32.xlu0 %v1793_v47, %s1285_s9 }
 0x1a4   : > { %1042 = vst.msk [vmem:[%s1413_s6 + $0xa8] sm:$0xff] %vm1020_vm1, %v977_v38  ;;  %1041 = vst.msk [vmem:[%s1413_s6 + $0xa0] sm:$0xff] %vm1020_vm1, %v976_v27 }
 0x1a5   : > { %v619_v56 = vpop.permute.xlu1 %618  ;;  %v617_v31 = vpop.permute.xlu0 %616 }
 0x1a6   : > { %v707_v16 = vadd.f32 %v619_v56, %v1624_v39  ;;  %v706_v1 = vadd.f32 %v617_v31, %v1627_v57 }
 0x1a7   : > { %922 = vrot.lane.b32.xlu1 %v1802_v19, %s1285_s9  ;;  %920 = vrot.lane.b32.xlu0 %v1805_v20, %s1285_s9 }
 0x1a9   : > { %v651_v46 = vpop.permute.xlu1 %650  ;;  %v649_v29 = vpop.permute.xlu0 %648 }
 0x1aa   : > { %v723_v9 = vadd.f32 %v651_v46, %v1634_v58  ;;  %v722_v10 = vadd.f32 %v649_v29, %v1637_v59 }
 0x1ad   : > { %v747_v32 = vpop.permute.xlu1 %746  ;;  %v745_v49 = vpop.permute.xlu0 %744 }
 0x1ae   : > { %v835_v2 = vadd.f32 %v747_v32, %v707_v16  ;;  %v834_v5 = vadd.f32 %v745_v49, %v706_v1 }
 0x1b1   : > { %v779_v52 = vpop.permute.xlu1 %778  ;;  %v777_v53 = vpop.permute.xlu0 %776 }
 0x1b2   : > { %v851_v35 = vadd.f32 %v779_v52, %v723_v9  ;;  %v850_v13 = vadd.f32 %v777_v53, %v722_v10 }
 0x1b5   : > { %v875_v6 = vpop.permute.xlu1 %874  ;;  %v873_v26 = vpop.permute.xlu0 %872 }
 0x1b6   : > { %v963_v11 = vadd.f32 %v875_v6, %v835_v2  ;;  %v962_v12 = vadd.f32 %v873_v26, %v834_v5 }
 0x1b8   : > { %1028 = vst.msk [vmem:[%s1413_s6 + $0x38] sm:$0xff] %vm1020_vm1, %v963_v11  ;;  %1027 = vst.msk [vmem:[%s1413_s6 + $0x30] sm:$0xff] %vm1020_vm1, %v962_v12 }
 0x1b9   : > { %v907_v39 = vpop.permute.xlu1 %906  ;;  %v905_v57 = vpop.permute.xlu0 %904 }
 0x1ba   : > { %v979_v14 = vadd.f32 %v907_v39, %v851_v35  ;;  %v978_v15 = vadd.f32 %v905_v57, %v850_v13 }
 0x1bc   : > { %1044 = vst.msk [vmem:[%s1413_s6 + $0xb8] sm:$0xff] %vm1020_vm1, %v979_v14  ;;  %1043 = vst.msk [vmem:[%s1413_s6 + $0xb0] sm:$0xff] %vm1020_vm1, %v978_v15 }
 0x1bd   : > { %v623_v36 = vpop.permute.xlu1 %622  ;;  %v621_v58 = vpop.permute.xlu0 %620 }
 0x1be   : > { %v709_v48 = vadd.f32 %v623_v36, %v1660_v61  ;;  %v708_v45 = vadd.f32 %v621_v58, %v1663_v62 }
 0x1c1   : > { %v655_v18 = vpop.permute.xlu1 %654  ;;  %v653_v59 = vpop.permute.xlu0 %652 }
 0x1c2   : > { %v725_v54 = vadd.f32 %v655_v18, %v1670_v63  ;;  %v724_v28 = vadd.f32 %v653_v59, %v1673_v0 }
 0x1c5   : > { %v751_v40 = vpop.permute.xlu1 %750  ;;  %v749_v41 = vpop.permute.xlu0 %748 }
 0x1c6   : > { %v837_v22 = vadd.f32 %v751_v40, %v709_v48  ;;  %v836_v23 = vadd.f32 %v749_v41, %v708_v45 }
 0x1c9   : > { %v783_v21 = vpop.permute.xlu1 %782  ;;  %v781_v43 = vpop.permute.xlu0 %780 }
 0x1ca   : > { %v853_v51 = vadd.f32 %v783_v21, %v725_v54  ;;  %v852_v33 = vadd.f32 %v781_v43, %v724_v28 }
 0x1cd   : > { %v879_v24 = vpop.permute.xlu1 %878  ;;  %v877_v25 = vpop.permute.xlu0 %876 }
 0x1ce   : > { %v965_v50 = vadd.f32 %v879_v24, %v837_v22  ;;  %v964_v30 = vadd.f32 %v877_v25, %v836_v23 }
 0x1d0   : > { %1030 = vst.msk [vmem:[%s1413_s6 + $0x48] sm:$0xff] %vm1020_vm1, %v965_v50  ;;  %1029 = vst.msk [vmem:[%s1413_s6 + $0x40] sm:$0xff] %vm1020_vm1, %v964_v30 }
 0x1d1   : > { %v911_v61 = vpop.permute.xlu1 %910  ;;  %v909_v62 = vpop.permute.xlu0 %908 }
 0x1d2   : > { %v981_v60 = vadd.f32 %v911_v61, %v853_v51  ;;  %v980_v55 = vadd.f32 %v909_v62, %v852_v33 }
 0x1d4   : > { %1046 = vst.msk [vmem:[%s1413_s6 + $0xc8] sm:$0xff] %vm1020_vm1, %v981_v60  ;;  %1045 = vst.msk [vmem:[%s1413_s6 + $0xc0] sm:$0xff] %vm1020_vm1, %v980_v55 }
 0x1d5   : > { %v627_v38 = vpop.permute.xlu1 %626  ;;  %v625_v63 = vpop.permute.xlu0 %624 }
 0x1d6   : > { %v711_v32 = vadd.f32 %v627_v38, %v1696_v3  ;;  %v710_v49 = vadd.f32 %v625_v63, %v1699_v4 }
 0x1d9   : > { %v659_v27 = vpop.permute.xlu1 %658  ;;  %v657_v0 = vpop.permute.xlu0 %656 }
 0x1da   : > { %v727_v2 = vadd.f32 %v659_v27, %v1706_v7  ;;  %v726_v5 = vadd.f32 %v657_v0, %v1709_v8 }
 0x1dd   : > { %v755_v56 = vpop.permute.xlu1 %754  ;;  %v753_v31 = vpop.permute.xlu0 %752 }
 0x1de   : > { %v839_v52 = vadd.f32 %v755_v56, %v711_v32  ;;  %v838_v53 = vadd.f32 %v753_v31, %v710_v49 }
 0x1e1   : > { %v787_v46 = vpop.permute.xlu1 %786  ;;  %v785_v29 = vpop.permute.xlu0 %784 }
 0x1e2   : > { %v855_v9 = vadd.f32 %v787_v46, %v727_v2  ;;  %v854_v10 = vadd.f32 %v785_v29, %v726_v5 }
 0x1e5   : > { %v883_v16 = vpop.permute.xlu1 %882  ;;  %v881_v1 = vpop.permute.xlu0 %880 }
 0x1e6   : > { %v967_v6 = vadd.f32 %v883_v16, %v839_v52  ;;  %v966_v26 = vadd.f32 %v881_v1, %v838_v53 }
 0x1e8   : > { %1032 = vst.msk [vmem:[%s1413_s6 + $0x58] sm:$0xff] %vm1020_vm1, %v967_v6  ;;  %1031 = vst.msk [vmem:[%s1413_s6 + $0x50] sm:$0xff] %vm1020_vm1, %v966_v26 }
 0x1e9   : > { %v915_v3 = vpop.permute.xlu1 %914  ;;  %v913_v4 = vpop.permute.xlu0 %912 }
 0x1ea   : > { %v983_v11 = vadd.f32 %v915_v3, %v855_v9  ;;  %v982_v12 = vadd.f32 %v913_v4, %v854_v10 }
 0x1ec   : > { %1048 = vst.msk [vmem:[%s1413_s6 + $0xd8] sm:$0xff] %vm1020_vm1, %v983_v11  ;;  %1047 = vst.msk [vmem:[%s1413_s6 + $0xd0] sm:$0xff] %vm1020_vm1, %v982_v12 }
 0x1ed   : > { %v631_v35 = vpop.permute.xlu1 %630  ;;  %v629_v7 = vpop.permute.xlu0 %628 }
 0x1ee   : > { %v713_v36 = vadd.f32 %v631_v35, %v1742_v34  ;;  %v712_v58 = vadd.f32 %v629_v7, %v1745_v37 }
 0x1f1   : > { %v663_v13 = vpop.permute.xlu1 %662  ;;  %v661_v8 = vpop.permute.xlu0 %660 }
 0x1f2   : > { %v729_v21 = vadd.f32 %v663_v13, %v1754_v42  ;;  %v728_v43 = vadd.f32 %v661_v8, %v1757_v44 }
 0x1f5   : > { %v759_v39 = vpop.permute.xlu1 %758  ;;  %v757_v57 = vpop.permute.xlu0 %756 }
 0x1f6   : > { %v841_v18 = vadd.f32 %v759_v39, %v713_v36  ;;  %v840_v59 = vadd.f32 %v757_v57, %v712_v58 }
 0x1f9   : > { %v791_v14 = vpop.permute.xlu1 %790  ;;  %v789_v15 = vpop.permute.xlu0 %788 }
 0x1fa   : > { %v857_v22 = vadd.f32 %v791_v14, %v729_v21  ;;  %v856_v23 = vadd.f32 %v789_v15, %v728_v43 }
 0x1fd   : > { %v887_v40 = vpop.permute.xlu1 %886  ;;  %v885_v41 = vpop.permute.xlu0 %884 }
 0x1fe   : > { %v969_v48 = vadd.f32 %v887_v40, %v841_v18  ;;  %v968_v45 = vadd.f32 %v885_v41, %v840_v59 }
 0x200   : > { %1034 = vst.msk [vmem:[%s1413_s6 + $0x68] sm:$0xff] %vm1020_vm1, %v969_v48  ;;  %1033 = vst.msk [vmem:[%s1413_s6 + $0x60] sm:$0xff] %vm1020_vm1, %v968_v45 }
 0x201   : > { %v919_v34 = vpop.permute.xlu1 %918  ;;  %v917_v37 = vpop.permute.xlu0 %916 }
 0x202   : > { %v985_v24 = vadd.f32 %v919_v34, %v857_v22  ;;  %v984_v25 = vadd.f32 %v917_v37, %v856_v23 }
 0x204   : > { %1050 = vst.msk [vmem:[%s1413_s6 + $0xe8] sm:$0xff] %vm1020_vm1, %v985_v24  ;;  %1049 = vst.msk [vmem:[%s1413_s6 + $0xe0] sm:$0xff] %vm1020_vm1, %v984_v25 }
 0x205   : > { %v635_v54 = vpop.permute.xlu1 %634  ;;  %v633_v42 = vpop.permute.xlu0 %632 }
 0x206   : > { %v715_v61 = vadd.f32 %v635_v54, %v1790_v17  ;;  %v714_v62 = vadd.f32 %v633_v42, %v1793_v47 }
 0x209   : > { %v667_v28 = vpop.permute.xlu1 %666  ;;  %v665_v44 = vpop.permute.xlu0 %664 }
 0x20a   : > { %v731_v27 = vadd.f32 %v667_v28, %v1802_v19  ;;  %v730_v0 = vadd.f32 %v665_v44, %v1805_v20 }
 0x20d   : > { %v763_v50 = vpop.permute.xlu1 %762  ;;  %v761_v30 = vpop.permute.xlu0 %760 }
 0x20e   : > { %v843_v60 = vadd.f32 %v763_v50, %v715_v61  ;;  %v842_v55 = vadd.f32 %v761_v30, %v714_v62 }
 0x211   : > { %v795_v51 = vpop.permute.xlu1 %794  ;;  %v793_v33 = vpop.permute.xlu0 %792 }
 0x212   : > { %v859_v46 = vadd.f32 %v795_v51, %v731_v27  ;;  %v858_v29 = vadd.f32 %v793_v33, %v730_v0 }
 0x215   : > { %v891_v38 = vpop.permute.xlu1 %890  ;;  %v889_v63 = vpop.permute.xlu0 %888 }
 0x216   : > { %v971_v56 = vadd.f32 %v891_v38, %v843_v60  ;;  %v970_v31 = vadd.f32 %v889_v63, %v842_v55 }
 0x218   : > { %1036 = vst.msk [vmem:[%s1413_s6 + $0x78] sm:$0xff] %vm1020_vm1, %v971_v56  ;;  %1035 = vst.msk [vmem:[%s1413_s6 + $0x70] sm:$0xff] %vm1020_vm1, %v970_v31 }
 0x219   : > { %v923_v17 = vpop.permute.xlu1 %922  ;;  %v921_v47 = vpop.permute.xlu0 %920 }
 0x21a   : > { %v987_v32 = vadd.f32 %v923_v17, %v859_v46  ;;  %v986_v49 = vadd.f32 %v921_v47, %v858_v29 }
 0x21c   : > { %1052 = vst.msk [vmem:[%s1413_s6 + $0xf8] sm:$0xff] %vm1020_vm1, %v987_v32  ;;  %1051 = vst.msk [vmem:[%s1413_s6 + $0xf0] sm:$0xff] %vm1020_vm1, %v986_v49 }
 0x21d PF: > { %s13_s12 = sadd.s32 1, %s1280_s12  }
 0x21e   : > { %p10_p4 = scmp.ge.s32.totalorder %s13_s12, 4  }
 0x220   :  { %12 = sbr.rel (!%p10_p4) target bundleno = 1 (0x1), region = 62 }

</bundles_post_ra>
